<compile_context>
chip_gen: v5e
topology: v5e:2x2
jax: 0.10.0
libtpu: 0.0.40
codegen_flags: <defaults>
</compile_context>

<pallas_src>
import jax
import jax.numpy as jnp
from jax.experimental import pallas as pl
from jax.experimental.pallas import tpu as pltpu


# ---------------------------------------------------------------------------
# Kernel
# ---------------------------------------------------------------------------
def _attention_kernel(g_ref, x_ref, wg_ref, wx_ref, b_ref, wpsi_ref, bpsi_ref,
                      out_ref):
    # Blocks: g_ref (F_g, TP), x_ref/out_ref (F_l, TP); pixels on the lane axis.
    x = x_ref[...]                      # io dtype (bf16 by default) — MXU operand

    # Fused 1x1 convs (eval-mode BN folded into weights/bias) -> (F_int, TP) f32
    a = jnp.dot(wg_ref[...], g_ref[...], preferred_element_type=jnp.float32)
    a = a + jnp.dot(wx_ref[...], x, preferred_element_type=jnp.float32)
    a = jnp.maximum(a + b_ref[...], 0.0)                  # ReLU(g1 + x1), f32

    # psi = sigmoid(BN(Conv1x1(a))): VPU multiply + sublane (XLU) reduction
    p = jnp.sum(a * wpsi_ref[...], axis=0, keepdims=True) + bpsi_ref[...]
    psi = jax.nn.sigmoid(p)                               # (1, TP) f32

    # out = x * psi — elementwise path kept in f32 (v5e has no bf16 VALU)
    out_ref[...] = (x.astype(jnp.float32) * psi).astype(out_ref.dtype)


# ---------------------------------------------------------------------------
# VMEM budgeting / tiling helpers
# ---------------------------------------------------------------------------
def _vmem_cap_bytes():
    """Generation-aware VMEM cap with >=25% headroom (v7x physical = 64 MiB)."""
    cap = 48 * 1024 * 1024
    try:
        info = pltpu.get_tpu_info()
        cap = min(int(info.vmem_capacity_bytes) * 3 // 4, 96 * 1024 * 1024)
    except Exception:
        pass
    return max(cap, 32 * 1024 * 1024)


def _vmem_budget_bytes(tp, F_g, F_l, F_int, in_b, out_b):
    io = 2 * tp * (F_g * in_b + F_l * in_b + F_l * out_b)      # 2x-buffered pixel tiles
    w = 2 * (F_int * (F_g + F_l) * in_b + 2 * F_int * 4 + 4)   # weights (2x, conservative)
    interm = tp * (F_int + 2) * 4                              # f32 'a' + psi rows
    return io + w + interm


def _choose_tile_p(hw_pad, desired, fits, n_batch):
    """Largest multiple-of-128 divisor of hw_pad that is <= desired and fits VMEM."""
    cands = sorted((t for t in range(128, hw_pad + 1, 128) if hw_pad % t == 0),
                   reverse=True)
    tp = cands[-1]                                   # 128 (hw_pad is a 128 multiple)
    for t in cands:
        if t <= desired and fits(t):
            tp = t
            break
    # Expose >= 4 grid steps when possible so v7x's two TensorCores stay balanced.
    if n_batch * (hw_pad // tp) < 4:
        for t in cands:
            if t <= tp and n_batch * (hw_pad // t) >= 4:
                tp = t
                break
    return tp


# ---------------------------------------------------------------------------
# Wrapper
# ---------------------------------------------------------------------------
def attention_block(g_nchw, x_nchw, folded, *, tile_p=4096,
                    io_dtype=jnp.bfloat16, out_dtype=None):
    """g_nchw: (N, F_g, H, W), x_nchw: (N, F_l, H, W) -> (N, F_l, H, W)."""
    N, F_g, H, W = g_nchw.shape
    _, F_l, _, _ = x_nchw.shape
    F_int = folded["wg_t"].shape[0]
    HW = H * W
    out_dtype = io_dtype if out_dtype is None else out_dtype

    # NCHW -> (N, C, H*W): pure reshape; pixels land on the 128-wide lane axis.
    g_mat = g_nchw.reshape(N, F_g, HW).astype(io_dtype)
    x_mat = x_nchw.reshape(N, F_l, HW).astype(io_dtype)

    # Pad the pixel axis to a multiple of 128 instead of one giant tile.
    HW_pad = ((HW + 127) // 128) * 128
    if HW_pad != HW:
        pad = ((0, 0), (0, 0), (0, HW_pad - HW))
        g_mat = jnp.pad(g_mat, pad)
        x_mat = jnp.pad(x_mat, pad)

    in_b = jnp.dtype(io_dtype).itemsize
    out_b = jnp.dtype(out_dtype).itemsize
    cap = _vmem_cap_bytes()
    margin = 8 * 1024 * 1024
    fits = lambda t: _vmem_budget_bytes(t, F_g, F_l, F_int, in_b, out_b) + margin <= cap
    tp = _choose_tile_p(HW_pad, tile_p, fits, N)
    grid = (N, HW_pad // tp)

    budget = _vmem_budget_bytes(tp, F_g, F_l, F_int, in_b, out_b)
    vmem_limit = int(min(cap, max(16 * 1024 * 1024, budget + margin)))

    # MXU operands in io (bf16) dtype; tiny bias / psi params stay f32 for precision.
    wg = folded["wg_t"].astype(io_dtype)          # (F_int, F_g)
    wx = folded["wx_t"].astype(io_dtype)          # (F_int, F_l)
    b_sum = folded["b_sum"].astype(jnp.float32)   # (F_int, 1)
    wpsi = folded["wpsi_col"].astype(jnp.float32) # (F_int, 1)
    bpsi = folded["bpsi"].astype(jnp.float32)     # (1, 1)

    def pix_spec(c):
        return pl.BlockSpec((None, c, tp), lambda n, i: (n, 0, i))

    def full_spec(shape):
        return pl.BlockSpec(shape, lambda n, i: tuple(0 for _ in shape))

    out_mat = pl.pallas_call(
        _attention_kernel,
        out_shape=jax.ShapeDtypeStruct((N, F_l, HW_pad), out_dtype),
        grid_spec=pltpu.PrefetchScalarGridSpec(
            num_scalar_prefetch=0,
            grid=grid,
            in_specs=[
                pix_spec(F_g),                  # g pixels  (F_g, tp)
                pix_spec(F_l),                  # x pixels  (F_l, tp)
                full_spec((F_int, F_g)),        # folded W_g^T (io dtype)
                full_spec((F_int, F_l)),        # folded W_x^T (io dtype)
                full_spec((F_int, 1)),          # fused bias (f32)
                full_spec((F_int, 1)),          # folded psi weight column (f32)
                full_spec((1, 1)),              # folded psi bias (f32)
            ],
            out_specs=pl.BlockSpec((None, F_l, tp), lambda n, i: (n, 0, i)),
        ),
        compiler_params=pltpu.CompilerParams(
            dimension_semantics=("parallel", "parallel"),
            vmem_limit_bytes=vmem_limit),
    )(g_mat, x_mat, wg, wx, b_sum, wpsi, bpsi)

    if HW_pad != HW:
        out_mat = out_mat[:, :, :HW]
    # (N, F_l, H*W) -> NCHW: pure reshape.
    return out_mat.reshape(N, F_l, H, W)


# ---------------------------------------------------------------------------
# Parameters (torch-equivalent, eval-mode BN) and host-side folding
# ---------------------------------------------------------------------------
def make_params(key, F_g, F_l, F_int):
    """Synthetic Conv1x1 + eval-mode BatchNorm parameters (non-trivial stats)."""
    ks = jax.random.split(key, 18)

    def bn(kg, kb, km, kv, c):
        return dict(
            gamma=1.0 + 0.1 * jax.random.normal(kg, (c,), jnp.float32),
            beta=0.1 * jax.random.normal(kb, (c,), jnp.float32),
            mean=0.1 * jax.random.normal(km, (c,), jnp.float32),
            var=jnp.abs(1.0 + 0.1 * jax.random.normal(kv, (c,), jnp.float32)),
        )

    return dict(
        wg=0.2 * jax.random.normal(ks[0], (F_g, F_int), jnp.float32),   # (C_in, C_out)
        bg=0.2 * jax.random.normal(ks[1], (F_int,), jnp.float32),
        wx=0.2 * jax.random.normal(ks[2], (F_l, F_int), jnp.float32),
        bx=0.2 * jax.random.normal(ks[3], (F_int,), jnp.float32),
        wpsi=0.2 * jax.random.normal(ks[4], (F_int, 1), jnp.float32),
        bpsi=0.2 * jax.random.normal(ks[5], (1,), jnp.float32),
        bn_g=bn(ks[6], ks[7], ks[8], ks[9], F_int),
        bn_x=bn(ks[10], ks[11], ks[12], ks[13], F_int),
        bn_psi=bn(ks[14], ks[15], ks[16], ks[17], 1),
    )


def fold_params(p, eps=1e-5):
    """Fold eval-mode BatchNorm into the 1x1-conv weights/biases (host-side)."""
    def scale_shift(bn):
        s = bn["gamma"] / jnp.sqrt(bn["var"] + eps)
        t = bn["beta"] - bn["mean"] * s
        return s, t

    sg, tg = scale_shift(p["bn_g"])
    sx, tx = scale_shift(p["bn_x"])
    sp, tp_ = scale_shift(p["bn_psi"])

    wg_t = (p["wg"] * sg[None, :]).T                       # (F_int, F_g)
    wx_t = (p["wx"] * sx[None, :]).T                       # (F_int, F_l)
    b_sum = ((p["bg"] * sg + tg) + (p["bx"] * sx + tx)).reshape(-1, 1)
    wpsi_col = (p["wpsi"][:, 0] * sp[0]).reshape(-1, 1)    # (F_int, 1)
    bpsi = (p["bpsi"] * sp + tp_).reshape(1, 1)            # (1, 1)
    return dict(wg_t=wg_t, wx_t=wx_t, b_sum=b_sum, wpsi_col=wpsi_col, bpsi=bpsi)


# ---------------------------------------------------------------------------
# Pure-JAX reference of the PyTorch module (unfolded, eval-mode BN, f32)
# ---------------------------------------------------------------------------
def _reference(g_nchw, x_nchw, p, eps=1e-5):
    def conv1x1(x, w, b):                                   # w: (C_in, C_out)
        return jnp.einsum("nchw,cd->ndhw", x, w) + b[None, :, None, None]

    def bn(x, bnp):
        s = bnp["gamma"] / jnp.sqrt(bnp["var"] + eps)
        t = bnp["beta"] - bnp["mean"] * s
        return x * s[None, :, None, None] + t[None, :, None, None]

    g1 = bn(conv1x1(g_nchw, p["wg"], p["bg"]), p["bn_g"])
    x1 = bn(conv1x1(x_nchw, p["wx"], p["bx"]), p["bn_x"])
    a = jnp.maximum(g1 + x1, 0.0)
    psi = jax.nn.sigmoid(bn(conv1x1(a, p["wpsi"], p["bpsi"]), p["bn_psi"]))
    return x_nchw * psi


if __name__ == "__main__":
    # Small shapes: batch=2, F_g=F_l=4, F_int=8, spatial 16x16.
    N, F_g, F_l, F_int, H, W = 2, 4, 4, 8, 16, 16

    key = jax.random.PRNGKey(0)
    kg, kx, kp = jax.random.split(key, 3)
    g = jax.random.normal(kg, (N, F_g, H, W), jnp.float32)
    x = jax.random.normal(kx, (N, F_l, H, W), jnp.float32)
    params = make_params(kp, F_g, F_l, F_int)
    folded = fold_params(params)

    out = attention_block(g, x, folded)        # bf16 I/O by default
    out = jax.block_until_ready(out)

    ref = _reference(g, x, params)
    assert out.shape == (N, F_l, H, W)
    # bf16 input/weight/output rounding -> widened tolerance (f32 math inside).
    assert jnp.allclose(out.astype(jnp.float32), ref, atol=3e-2, rtol=3e-2)

    print("KERNEL_OK")
</pallas_src>

<mosaic_0001>
module attributes {stable_mosaic.version = 11 : i64} {
  func.func @_attention_kernel(%arg0: i32, %arg1: i32, %arg2: memref<1x4x128xbf16, #tpu.memory_space<vmem>>, %arg3: memref<1x4x128xbf16, #tpu.memory_space<vmem>>, %arg4: memref<8x4xbf16, #tpu.memory_space<vmem>>, %arg5: memref<8x4xbf16, #tpu.memory_space<vmem>>, %arg6: memref<8x1xf32, #tpu.memory_space<vmem>>, %arg7: memref<8x1xf32, #tpu.memory_space<vmem>>, %arg8: memref<1x1xf32, #tpu.memory_space<vmem>>, %arg9: memref<1x4x128xbf16, #tpu.memory_space<vmem>>) attributes {dimension_semantics = [#tpu.dimension_semantics<parallel>, #tpu.dimension_semantics<parallel>], iteration_bounds = array<i64: 2, 2>, scalar_prefetch = 0 : i64, scratch_operands = 0 : i64, tpu.core_type = #tpu.core_type<tc>, window_params = [{transform_indices = @transform_0, window_bounds = array<i64: 1, 4, 128>}, {transform_indices = @transform_1, window_bounds = array<i64: 1, 4, 128>}, {pipeline_mode = #tpu.pipeline_mode<synchronous>, transform_indices = @transform_2, window_bounds = array<i64: 8, 4>}, {pipeline_mode = #tpu.pipeline_mode<synchronous>, transform_indices = @transform_3, window_bounds = array<i64: 8, 4>}, {pipeline_mode = #tpu.pipeline_mode<synchronous>, transform_indices = @transform_4, window_bounds = array<i64: 8, 1>}, {pipeline_mode = #tpu.pipeline_mode<synchronous>, transform_indices = @transform_5, window_bounds = array<i64: 8, 1>}, {pipeline_mode = #tpu.pipeline_mode<synchronous>, transform_indices = @transform_6, window_bounds = array<i64: 1, 1>}, {transform_indices = @transform_7, window_bounds = array<i64: 1, 4, 128>}]} {
    %c0 = arith.constant 0 : index
    %c0_0 = arith.constant 0 : index
    %c0_1 = arith.constant 0 : index
    %0 = vector.load %arg3[%c0, %c0_0, %c0_1] : memref<1x4x128xbf16, #tpu.memory_space<vmem>>, vector<1x4x128xbf16>
    %1 = vector.shape_cast %0 : vector<1x4x128xbf16> to vector<4x128xbf16>
    %c0_2 = arith.constant 0 : index
    %c0_3 = arith.constant 0 : index
    %2 = vector.load %arg4[%c0_2, %c0_3] : memref<8x4xbf16, #tpu.memory_space<vmem>>, vector<8x4xbf16>
    %c0_4 = arith.constant 0 : index
    %c0_5 = arith.constant 0 : index
    %c0_6 = arith.constant 0 : index
    %3 = vector.load %arg2[%c0_4, %c0_5, %c0_6] : memref<1x4x128xbf16, #tpu.memory_space<vmem>>, vector<1x4x128xbf16>
    %4 = vector.shape_cast %3 : vector<1x4x128xbf16> to vector<4x128xbf16>
    %cst = arith.constant dense<0.000000e+00> : vector<8x128xf32>
    %5 = tpu.matmul %2, %4, %cst {dimension_numbers = #tpu.dot_dimension_numbers<[1], [0], [0], [1], [0, 0, 1, 1], [], []>} : vector<8x4xbf16>, vector<4x128xbf16>, vector<8x128xf32> -> vector<8x128xf32>
    %c0_7 = arith.constant 0 : index
    %c0_8 = arith.constant 0 : index
    %6 = vector.load %arg5[%c0_7, %c0_8] : memref<8x4xbf16, #tpu.memory_space<vmem>>, vector<8x4xbf16>
    %cst_9 = arith.constant dense<0.000000e+00> : vector<8x128xf32>
    %7 = tpu.matmul %6, %1, %cst_9 {dimension_numbers = #tpu.dot_dimension_numbers<[1], [0], [0], [1], [0, 0, 1, 1], [], []>} : vector<8x4xbf16>, vector<4x128xbf16>, vector<8x128xf32> -> vector<8x128xf32>
    %8 = arith.addf %5, %7 : vector<8x128xf32>
    %c0_10 = arith.constant 0 : index
    %c0_11 = arith.constant 0 : index
    %9 = vector.load %arg6[%c0_10, %c0_11] : memref<8x1xf32, #tpu.memory_space<vmem>>, vector<8x1xf32>
    %10 = vector.broadcast %9 : vector<8x1xf32> to vector<8x128xf32>
    %11 = arith.addf %8, %10 : vector<8x128xf32>
    %cst_12 = arith.constant 0.000000e+00 : f32
    %12 = vector.broadcast %cst_12 : f32 to vector<8x128xf32>
    %13 = arith.maximumf %11, %12 : vector<8x128xf32>
    %c0_13 = arith.constant 0 : index
    %c0_14 = arith.constant 0 : index
    %14 = vector.load %arg7[%c0_13, %c0_14] : memref<8x1xf32, #tpu.memory_space<vmem>>, vector<8x1xf32>
    %15 = vector.broadcast %14 : vector<8x1xf32> to vector<8x128xf32>
    %16 = arith.mulf %13, %15 : vector<8x128xf32>
    %cst_15 = arith.constant dense<0.000000e+00> : vector<128xf32>
    %17 = vector.multi_reduction <add>, %16, %cst_15 [0] : vector<8x128xf32> to vector<128xf32>
    %18 = vector.shape_cast %17 : vector<128xf32> to vector<1x128xf32>
    %c0_16 = arith.constant 0 : index
    %c0_17 = arith.constant 0 : index
    %19 = vector.load %arg8[%c0_16, %c0_17] : memref<1x1xf32, #tpu.memory_space<vmem>>, vector<1x1xf32>
    %20 = vector.broadcast %19 : vector<1x1xf32> to vector<1x128xf32>
    %21 = arith.addf %18, %20 : vector<1x128xf32>
    %22 = arith.negf %21 : vector<1x128xf32>
    %23 = math.exp %22 : vector<1x128xf32>
    %cst_18 = arith.constant 1.000000e+00 : f32
    %24 = vector.broadcast %cst_18 : f32 to vector<1x128xf32>
    %25 = arith.addf %24, %23 : vector<1x128xf32>
    %26 = arith.divf %24, %25 : vector<1x128xf32>
    %27 = arith.extf %1 : vector<4x128xbf16> to vector<4x128xf32>
    %28 = vector.broadcast %26 : vector<1x128xf32> to vector<4x128xf32>
    %29 = arith.mulf %27, %28 : vector<4x128xf32>
    %30 = arith.truncf %29 : vector<4x128xf32> to vector<4x128xbf16>
    %c0_19 = arith.constant 0 : index
    %c0_20 = arith.constant 0 : index
    %c0_21 = arith.constant 0 : index
    %31 = vector.load %arg9[%c0_19, %c0_20, %c0_21] : memref<1x4x128xbf16, #tpu.memory_space<vmem>>, vector<1x4x128xbf16>
    %32 = vector.shape_cast %31 : vector<1x4x128xbf16> to vector<4x128xbf16>
    %33 = vector.shape_cast %30 : vector<4x128xbf16> to vector<1x4x128xbf16>
    tpu.vector_store %arg9[%c0_19, %c0_20, %c0_21], %33 {strides = array<i32>} : memref<1x4x128xbf16, #tpu.memory_space<vmem>>, vector<1x4x128xbf16>,
    return
  }
  func.func @transform_0(%arg0: i32, %arg1: i32) -> (i32, i32, i32) {
    %c0_i32 = arith.constant 0 : i32
    %c0_i32_0 = arith.constant 0 : i32
    return %arg0, %c0_i32, %arg1 : i32, i32, i32
  }
  func.func @transform_1(%arg0: i32, %arg1: i32) -> (i32, i32, i32) {
    %c0_i32 = arith.constant 0 : i32
    %c0_i32_0 = arith.constant 0 : i32
    return %arg0, %c0_i32, %arg1 : i32, i32, i32
  }
  func.func @transform_2(%arg0: i32, %arg1: i32) -> (i32, i32) {
    %c0_i32 = arith.constant 0 : i32
    %c0_i32_0 = arith.constant 0 : i32
    %c0_i32_1 = arith.constant 0 : i32
    return %c0_i32, %c0_i32_0 : i32, i32
  }
  func.func @transform_3(%arg0: i32, %arg1: i32) -> (i32, i32) {
    %c0_i32 = arith.constant 0 : i32
    %c0_i32_0 = arith.constant 0 : i32
    %c0_i32_1 = arith.constant 0 : i32
    return %c0_i32, %c0_i32_0 : i32, i32
  }
  func.func @transform_4(%arg0: i32, %arg1: i32) -> (i32, i32) {
    %c0_i32 = arith.constant 0 : i32
    %c0_i32_0 = arith.constant 0 : i32
    %c0_i32_1 = arith.constant 0 : i32
    return %c0_i32, %c0_i32_0 : i32, i32
  }
  func.func @transform_5(%arg0: i32, %arg1: i32) -> (i32, i32) {
    %c0_i32 = arith.constant 0 : i32
    %c0_i32_0 = arith.constant 0 : i32
    %c0_i32_1 = arith.constant 0 : i32
    return %c0_i32, %c0_i32_0 : i32, i32
  }
  func.func @transform_6(%arg0: i32, %arg1: i32) -> (i32, i32) {
    %c0_i32 = arith.constant 0 : i32
    %c0_i32_0 = arith.constant 0 : i32
    %c0_i32_1 = arith.constant 0 : i32
    return %c0_i32, %c0_i32_0 : i32, i32
  }
  func.func @transform_7(%arg0: i32, %arg1: i32) -> (i32, i32, i32) {
    %c0_i32 = arith.constant 0 : i32
    %c0_i32_0 = arith.constant 0 : i32
    return %arg0, %c0_i32, %arg1 : i32, i32, i32
  }
}

</mosaic_0001>

<bundles_post_ra>
// kernel: tpu_custom_call.1
= control target key start
LH: loop header
LB: loop body
LE: loop exit
PB: predicated region body
PF: predicated region fallthrough
CT: control target
= control target key end

     0   :  { %s919_s0 = inlined_call_operand.vmem [shape: bf16[2,4,256], index: 0, kind: input, shape index: {}]   ;;  %s920_s1 = inlined_call_operand.vmem [shape: bf16[2,4,256], index: 1, kind: input, shape index: {}]   ;;  %s921_s2 = inlined_call_operand.vmem [shape: bf16[8,4], index: 2, kind: input, shape index: {}]   ;;  %s922_s3 = inlined_call_operand.vmem [shape: bf16[8,4], index: 3, kind: input, shape index: {}]   ;;  %s923_s4 = inlined_call_operand.vmem [shape: f32[8,1], index: 4, kind: input, shape index: {}]   ;;  %s924_s5 = inlined_call_operand.vmem [shape: f32[8,1], index: 5, kind: input, shape index: {}]   ;;  %s925_s6 = inlined_call_operand.<no memory space> [shape: f32[1,1], index: 6, kind: input, shape index: {}]   ;;  %s926_s7 = inlined_call_operand.hbm [shape: bf16[2,4,256], index: 7, kind: output, shape index: {}]  }
   0x1   :  { %v12_v0 = vstv %s925_s6 }
   0x2   :  { %13 = vst [vmem:[#allocation2] sm:$0x1] %v12_v0 }
   0x3   :  { %14 = vsyncpa [#allocation4], 0 }
   0x4   :  { %16 = vsyncpa [#allocation4 + $0x1], 0  ;;  %s782_s26 = smov 0   ;;  %s784_s27 = smov 0  }
   0x5   :  { %s786_s28 = smov 0   ;;  %s788_s29 = smov 0  }
   0x6   :  { %s790_s30 = smov 0   ;;  %s792_s8 = smov 0  }
   0x7   :  { %s794_s9 = smov 0   ;;  %s796_s10 = smov 0  }
   0x8 LB: > { %s546_s6 = sadd.s32 4294967295, %s736_s10   ;;  %s547_s11 = sadd.s32 4294967294, %s736_s10   ;;  %s736_s10 = sphi %s796_s10, %s22_s10   ;;  %s732_s9 = sphi %s794_s9, %s941_s9   ;;  %s728_s8 = sphi %s792_s8, %s940_s8   ;;  %s724_s30 = sphi %s790_s30, %s939_s30   ;;  %s720_s29 = sphi %s788_s29, %s938_s29   ;;  %s716_s28 = sphi %s786_s28, %s937_s28   ;;  %s712_s27 = sphi %s784_s27, %s936_s27   ;;  %s708_s26 = sphi %s782_s26, %s935_s26  }
   0x9   : > { %s31_s12 = sadd.s32 1, %s728_s8  ;;  %s34_s13 = sadd.s32 1, %s732_s9 }
   0xa   : > { %p32_p0 = scmp.ge.s32.totalorder %s31_s12, 2  ;;  %p214_p1 = scmp.ne.s32.totalorder %s716_s28, %s712_s27 }
   0xb   : > { %p215_p2 = scmp.eq.s32.totalorder %s546_s6, 3  ;;  %p220_p5 = scmp.ne.s32.totalorder %s712_s27, %s708_s26 }
   0xc   : > { %s943_s12 = smov (%p32_p0, %s31_s12), 0  ;;  %s945_s13 = smov (!%p32_p0, %s34_s13), %s732_s9 }
   0xd   : > { %929 = sst [smem:[#allocation6_spill]] %s943_s12  ;;  %s200_s14 = ssub.s32 %s728_s8, %s943_s12 }
   0xe   : > { %p833_p3 = por %p215_p2, %p214_p1  ;;  %p36_p4 = scmp.ge.s32.totalorder %s945_s13, 2 }
   0xf   : > { %p221_p6 = scmp.eq.s32.totalorder %s547_s11, 3  ;;  %p550_p7 = scmp.ge.s32.totalorder %s736_s10, 1 }
  0x10   : > { %s947_s13 = smov (%p36_p4, %s945_s13), 0  ;;  %p276_p9 = scmp.lt.s32.totalorder %s736_s10, 5 }
  0x11   : > { %931 = sst [smem:[#allocation7_spill]] %s947_s13  ;;  %p842_p8 = por %p221_p6, %p220_p5 }
  0x12   : > { %s199_s17 = ssub.s32 %s732_s9, %s947_s13  ;;  %s204_s18 = sadd.s32 1, %s716_s28 }
  0x13   : > { %s201_s19 = sor.u32 %s200_s14, %s199_s17  ;;  %p277_p10 = pnand %p550_p7, %p276_p9 }
  0x14   : > { %p202_p11 = scmp.eq.s32.totalorder %s201_s19, 0  ;;  %p319_p12 = scmp.lt.s32.totalorder (!%p277_p10), %s724_s30, 1 }
  0x15   : > { %280 = sbr.rel (%p277_p10) target bundleno = 221 (0xdd), region = 48  ;;  %p321_p13 = scmp.lt.s32.totalorder (!%p277_p10), %s720_s29, 1 }
  0x16   : > { %s851_s20 = scalar_select %p202_p11, %s716_s28, %s204_s18  }
  0x17   : > { %s316_s13 = sand.u32 (!%p277_p10), 1, %s712_s27  }
  0x18   : > { %s551_s14 = sshll.u32 (!%p277_p10), %s316_s13, 1 }
  0x1a   : > { %v738_v1 = vmov 0   ;;  %v380_v2 = vld [vmem:[%s923_s4] sm:$0xff]  ;;  %s320_s23 = scalar_select %p319_p12, %s724_s30, 1  ;;  %vm344_vm0 = vcmask 1041408   ;;  %vm340_vm1 = vcmask 31744  }
  0x1b   : > { %636 = vset.pattern.permute.xlu0 %v738_v1  ;;  %637 = vset.pattern.permute.xlu1 %v738_v1  ;;  %v401_v3 = vld [vmem:[#allocation2] sm:$0x1]  ;;  %s322_s24 = scalar_select %p321_p13, %s720_s29, 1 }
  0x1c   : > { %383 = vperm.xlu0 %636, %v380_v2   ;;  %404 = vperm.xlu1 %637, %v401_v3   ;;  %s552_s25 = sshll.u32 %s320_s23, 1  ;;  %v388_v6 = vld [vmem:[%s924_s5] sm:$0xff]  ;;  %s433_s23 = scalar_lea.sflag [#allocation4], %s316_s13 }
  0x1d   : > { %s324_s6 = sadd.s32 %s552_s25, %s322_s24  ;;  %v339_v9 = vld [vmem:[%s922_s3] sm:$0xf] }
  0x1e   : > { %s553_s11 = sshll.u32 %s324_s6, 1  ;;  %v337_v10 = vld [vmem:[%s921_s2] sm:$0xf] }
  0x1f   : > { %s334_s18 = scalar_lea.vmem %s920_s1, %s553_s11  ;;  %s326_s12 = scalar_lea.vmem %s919_s0, %s553_s11 }
  0x20   : > { %v336_v4 = vld [vmem:[%s334_s18] sm:$0x3] }
  0x21   : > { %v338_v5 = vld [vmem:[%s326_s12] sm:$0x3]  ;;  %v346_v7 = vsel %vm344_vm0, %v336_v4, 0  ;;  %s560_s12 = sshll.u32 %s724_s30, 1  ;;  %v428_v39 = vunpack.c.l.bf16 %v336_v4 }
  0x22   : > { %v365_v8 = vsel %vm344_vm0, %v338_v5, 0  ;;  %355 = vmatpush.bf16.msra.mxu0 %v346_v7  ;;  %s443_s11 = sadd.s32 %s720_s29, %s560_s12  ;;  %s318_s29 = scalar_lea.vmem [#allocation3], %s551_s14 }
  0x23   : > { %374 = vmatpush.bf16.msra.mxu1 %v365_v8  ;;  %s561_s17 = sshll.u32 %s443_s11, 1  ;;  %s447_s30 = sshll.u32 %s318_s29, 4  ;;  %s448_s30 = int_to_ptr.vmem [resolvable:$true] %s447_s30 }
  0x24   : > { %391 = vperm.xlu0 %636, %v388_v6   ;;  %s445_s21 = scalar_lea.hbm %s926_s7, %s561_s17  ;;  %s662_s11 = scalar_lea.hbm %s926_s7, 8 }
  0x25   : > { %556 = vmatmul.msk.bf16.vlgmr.msra.gmra.mxu0 %vm340_vm1, %v339_v9  ;;  %s449_s22 = sshll.u32 %s445_s21, 4  ;;  %s450_s22 = int_to_ptr.hbm [resolvable:$true] %s449_s22 }
  0x26   : > { %557 = vmatmul.msk.bf16.vlgmr.msra.gmra.mxu1 %vm340_vm1, %v337_v10  ;;  %s656_s24 = sshra.s32 %s450_s22, 4  ;;  %s657_s24 = int_to_ptr.hbm [resolvable:$true] %s656_s24 }
  0x27   : > { %s658_s25 = scalar_lea.hbm %s657_s24, 2  ;;  %p663_p4 = scmp.lt.s32.totalorder %s657_s24, %s926_s7 }
  0x28   : > { %p659_p0 = scmp.ne.s32.totalorder %s657_s24, %s658_s25  ;;  %p664_p5 = scmp.lt.s32.totalorder %s662_s11, %s658_s25 }
  0x2a   : > { %p660_p1 = pnand %p659_p0, %p833_p3  ;;  %p665_p6 = por %p664_p5, %p663_p4 }
  0x2c   : > { %p661_p2 = pneg %p660_p1 }
  0x2e   : > { %p666_p7 = pnand %p665_p6, %p661_p2 }
  0x8e   : > { %v384_v11 = vpop.permute.xlu0 %383  ;;  %v405_v24 = vpop.permute.xlu1 %404 }
  0x8f   : > { %v407_v27 = vperm.slane %v405_v24, 0 }
  0x96   : > { %v392_v17 = vpop.permute.xlu0 %391 }
  0xa2   : > { %v357_v12 = vpop.f32.mrf.mxu0 }
  0xa3   : > { %v376_v13 = vpop.f32.mrf.mxu1 }
  0xa4   : > { %v377_v14 = vadd.f32 %v376_v13, %v357_v12 }
  0xa6   : > { %v386_v15 = vadd.f32 %v384_v11, %v377_v14 }
  0xa8   : > { %v387_v16 = vmax.f32 %v386_v15, 0.0 }
  0xaa   : > { %v394_v18 = vmul.f32 %v392_v17, %v387_v16  ;;  %v359_v19 = vpop.f32.mrf.mxu0 }
  0xab   : > { %v378_v20 = vpop.f32.mrf.mxu1 }
  0xac   : > { %v395_v21 = vrot.slane %v394_v18, 4 }
  0xae   : > { %v396_v22 = vadd.f32 %v395_v21, %v394_v18 }
  0xb0   : > { %v397_v23 = vrot.slane %v396_v22, 2 }
  0xb2   : > { %v398_v25 = vadd.f32 %v397_v23, %v396_v22 }
  0xb4   : > { %v399_v26 = vrot.slane %v398_v25, 1 }
  0xb6   : > { %v400_v28 = vadd.f32 %v399_v26, %v398_v25 }
  0xb8   : > { %v408_v29 = vadd.f32 %v407_v27, %v400_v28 }
  0xba   : > { %v558_v30 = vmul.f32 -1.442695, %v408_v29 }
  0xbc   : > { %638 = vpow2.f32 %v558_v30 }
  0xc2   : > { %v639_v31 = vpop.eup %638 }
  0xc3   : > { %v412_v32 = vadd.f32 1.0, %v639_v31 }
  0xc5   : > { %640 = vrcp.f32 %v412_v32  ;;  %v424_v36 = vand.u32 2147483648, %v412_v32  ;;  %v422_v38 = vand.u32 2147483647, %v412_v32  ;;  %vm418_vm3 = vweird.f32 %v412_v32 }
  0xc7   : > { %v425_v41 = vor.u32 1.1754944e-38, %v424_v36  ;;  %vm423_vm5 = vcmp.eq.f32.partialorder %v422_v38, 8.507059e+37 }
  0xcb   : > { %v641_v33 = vpop.eup %640 }
  0xcc   : > { %v414_v34 = vmul.f32 %v641_v33, %v412_v32  ;;  %vm419_vm2 = vweird.f32 %v641_v33 }
  0xcd   : > { %vm420_vm4 = vmor %vm418_vm3, %vm419_vm2 }
  0xce   : > { %v415_v35 = vsub.f32 1.0, %v414_v34 }
  0xd0   : > { %v416_v37 = vmul.f32 %v641_v33, %v415_v35 }
  0xd2   : > { %v417_v40 = vadd.f32 %v641_v33, %v416_v37 }
  0xd4   : > { %v421_v42 = vsel %vm420_vm4, %v641_v33, %v417_v40 }
  0xd5   : > { %v426_v43 = vsel %vm423_vm5, %v425_v41, %v421_v42 }
  0xd6   : > { %v429_v44 = vmul.f32 %v428_v39, %v426_v43 }
  0xd8   : > { %v430_v45 = vpack.c.bf16 %v429_v44, %v429_v44 }
  0xda   : > { %431 = vst [vmem:[%s318_s29] sm:$0x3] %v430_v45 }
  0xdb   : > { %669 = shalt.err (!%p666_p7)
}
  0xdc   : > { %564 = dma.vmem_to_hbm [thread:$0]  (%p833_p3), %s448_s30, 32, %s450_s22, %s433_s23  }
  0xdd PF: > { %p570_p9 = scmp.ge.s32.totalorder %s736_s10, 2  ;;  %s461_s13 = sand.u32 1, %s708_s26  }
  0xde   : > { %s462_s18 = scalar_lea.sflag [#allocation4], %s461_s13 }
  0xdf   : > { %p567_p10 = pnand %p570_p9, %p842_p8 }
  0xe1   : > { %p568_p11 = pneg %p567_p10 }
  0xe3   : > { %703 = dma.done.wait (%p568_p11), %s462_s18, 32  }
  0xe4   : > { %705 = vsyncadd (%p568_p11), %s462_s18, 4294967264  ;;  %s22_s10 = sadd.s32 1, %s736_s10   ;;  %s933_s15 = sld [smem:[#allocation6_spill]] }
  0xe5   : > { %p19_p12 = scmp.ge.s32.totalorder %s22_s10, 6   ;;  %s934_s19 = sld [smem:[#allocation7_spill]] }
  0xe6   : > { %s935_s26 = smov %s712_s27  ;;  %s936_s27 = smov %s716_s28 }
  0xe7   : > { %s937_s28 = smov %s851_s20  ;;  %s938_s29 = smov %s728_s8 }
  0xe8   : > { %s939_s30 = smov %s732_s9  ;;  %21 = sbr.rel (!%p19_p12) target bundleno = 8 (0x8), region = 86 }
  0xea   : > { %s940_s8 = smov %s933_s15 }
  0xeb   : > { %s941_s9 = smov %s934_s19 }
  0xed   :  { %468 = vsyncpa [#allocation4], 1 }
  0xee   :  { %470 = vsyncpa [#allocation4 + $0x1], 1 }

</bundles_post_ra>
